<compile_context>
chip_gen: v6e
topology: v6e:2x2x1
jax: 0.10.0
libtpu: 0.0.40
codegen_flags: <defaults>
</compile_context>

<pallas_src>
import jax
import jax.numpy as jnp
from jax.experimental import pallas as pl
from jax.experimental.pallas import tpu as pltpu


def _copy_kernel(x_ref, o_ref):
    # Pure identity copy of a lane-dense (block_b, block_f) tile.
    o_ref[...] = x_ref[...]


def flatten(x: jax.Array, *, use_kernel: bool = True) -> jax.Array:
    """Flattens all non-batch dims: (B, ...) -> (B, prod(...)).

    Matches torch's x.view(x.size(0), -1) element order (row-major).
    With use_kernel=False this is a metadata-only jnp.reshape (the fastest
    option); use_kernel=True routes the copy through a tiled Pallas kernel.
    """
    b = x.shape[0]
    flat = 1
    for d in x.shape[1:]:
        flat *= d

    # Hoist the reshape out of the kernel: metadata-only on contiguous input.
    x2d = jnp.reshape(x, (b, flat))

    if not use_kernel:
        return x2d

    # --- Tile selection -----------------------------------------------------
    # Sublane (batch) block: full B if small, else 8 (min f32 sublane tile).
    block_b = b if b < 8 else 8
    # Lane (flat) block: lane-dense multiple of 128, capped at 2048 (hits
    # ~85%+ of HBM roofline with tiny per-buffer VMEM on all generations).
    if flat % 128 == 0:
        block_f = min(flat, 2048)
        # keep even division when possible so every block is full-width
        while flat % block_f != 0:
            block_f -= 128
        block_f = max(block_f, 128)
    else:
        # Fallback: whole flat dim as one block (full-extent dims are always
        # legal block shapes).
        block_f = flat

    grid = (pl.cdiv(b, block_b), pl.cdiv(flat, block_f))

    itemsize = jnp.dtype(x.dtype).itemsize
    nbytes = b * flat * itemsize

    return pl.pallas_call(
        _copy_kernel,
        out_shape=jax.ShapeDtypeStruct((b, flat), x.dtype),
        grid=grid,
        in_specs=[pl.BlockSpec((block_b, block_f), lambda i, j: (i, j))],
        out_specs=pl.BlockSpec((block_b, block_f), lambda i, j: (i, j)),
        compiler_params=pltpu.CompilerParams(
            # Both axes independent -> shard across v7x's 2 TensorCores;
            # free/no-op on single-TC v5e/v6e.
            dimension_semantics=("parallel", "parallel"),
            # Explicit, conservative scoped-VMEM budget (safe on v5e..v7x);
            # tiles here are KiB-scale so double-buffering always fits.
            vmem_limit_bytes=32 * 1024 * 1024,
        ),
        # Mem-bound copy: 0 flops, read + write the whole array once each.
        cost_estimate=pl.CostEstimate(
            flops=0, transcendentals=0, bytes_accessed=2 * nbytes
        ),
    )(x2d)


if __name__ == "__main__":
    key = jax.random.PRNGKey(0)
    B, C, H, W = 2, 4, 16, 16
    x = jax.random.normal(key, (B, C, H, W), dtype=jnp.float32)

    y = flatten(x)
    jax.block_until_ready(y)

    # Reference check against plain JAX reshape (== torch .view(B, -1)).
    y_ref = jnp.reshape(x, (B, C * H * W))
    assert y.shape == (B, C * H * W), y.shape
    assert y.dtype == x.dtype
    assert jnp.array_equal(y, y_ref), "mismatch vs reference flatten"

    # Also sanity-check the zero-cost (no-kernel) path.
    y_fast = flatten(x, use_kernel=False)
    assert jnp.array_equal(y_fast, y_ref)

    print("KERNEL_OK")
</pallas_src>

<mosaic_0001>
module attributes {stable_mosaic.version = 11 : i64} {
  func.func @_copy_kernel(%arg0: i32, %arg1: i32, %arg2: memref<2x1024xf32, #tpu.memory_space<vmem>>, %arg3: memref<2x1024xf32, #tpu.memory_space<vmem>>) attributes {dimension_semantics = [#tpu.dimension_semantics<parallel>, #tpu.dimension_semantics<parallel>], iteration_bounds = array<i64: 1, 1>, scalar_prefetch = 0 : i64, scratch_operands = 0 : i64, tpu.core_type = #tpu.core_type<tc>, window_params = [{transform_indices = @transform_0, window_bounds = array<i64: 2, 1024>}, {transform_indices = @transform_1, window_bounds = array<i64: 2, 1024>}]} {
    %c0 = arith.constant 0 : index
    %c0_0 = arith.constant 0 : index
    %0 = vector.load %arg2[%c0, %c0_0] : memref<2x1024xf32, #tpu.memory_space<vmem>>, vector<2x1024xf32>
    %c0_1 = arith.constant 0 : index
    %c0_2 = arith.constant 0 : index
    %1 = vector.load %arg3[%c0_1, %c0_2] : memref<2x1024xf32, #tpu.memory_space<vmem>>, vector<2x1024xf32>
    tpu.vector_store %arg3[%c0_1, %c0_2], %0 {strides = array<i32>} : memref<2x1024xf32, #tpu.memory_space<vmem>>, vector<2x1024xf32>,
    return
  }
  func.func @transform_0(%arg0: i32, %arg1: i32) -> (i32, i32) {
    %c0_i32 = arith.constant 0 : i32
    return %arg0, %arg1 : i32, i32
  }
  func.func @transform_1(%arg0: i32, %arg1: i32) -> (i32, i32) {
    %c0_i32 = arith.constant 0 : i32
    return %arg0, %arg1 : i32, i32
  }
}

</mosaic_0001>

<bundles_post_ra>
// kernel: tpu_custom_call.1
= control target key start
LH: loop header
LB: loop body
LE: loop exit
PB: predicated region body
PF: predicated region fallthrough
CT: control target
= control target key end

     0   :  { %6 = vsyncpa [#allocation3], 0  ;;  %s104_s0 = inlined_call_operand.hbm [shape: f32[2,1024], index: 0, kind: input, shape index: {}]   ;;  %s105_s1 = inlined_call_operand.hbm [shape: f32[2,1024], index: 1, kind: output, shape index: {}]  }
   0x1   :  { %7 = vsyncpa [#allocation4], 0  ;;  %s86_s6 = smov [#allocation2]  }
   0x2   :  { %s14_s7 = sshll.u32 %s86_s6, 4  ;;  %s15_s7 = int_to_ptr.vmem [resolvable:$true] %s14_s7 }
   0x3   :  { %s50_s8 = scalar_lea.vmem %s15_s7, 256  ;;  %p55_p1 = scmp.lt.s32.totalorder %s15_s7, %s15_s7 }
   0x4   :  { %p51_p0 = scmp.ne.s32.totalorder %s15_s7, %s50_s8  ;;  %p56_p2 = scmp.lt.s32.totalorder %s50_s8, %s50_s8 }
   0x6   :  { %p57_p3 = por %p56_p2, %p55_p1 }
   0x8   :  { %p58_p4 = pnand %p57_p3, %p51_p0 }
   0xa   :  { %61 = shalt.err (!%p58_p4)
}
   0xb   :  { %17 = dma.hbm_to_vmem [thread:$0]  %s104_s0, 256, %s15_s7, [#allocation3]  }
   0xc   :  { %82 = dma.done.wait [#allocation3], 256  }
   0xd   :  { %83 = vsyncadd [#allocation3], 4294967040  ;;  %s87_s11 = smov [#allocation5]   ;;  %v21_v0 = vld [vmem:[#allocation2] sm:$0xff]  ;;  %v22_v1 = vld [vmem:[#allocation2 + $0x8] sm:$0xff] }
   0xe   :  { %s31_s12 = sshll.u32 %s87_s11, 4  ;;  %23 = vst [vmem:[#allocation5] sm:$0xff] %v21_v0  ;;  %24 = vst [vmem:[#allocation5 + $0x8] sm:$0xff] %v22_v1  ;;  %s32_s12 = int_to_ptr.vmem [resolvable:$true] %s31_s12 }
   0xf   :  { %s62_s13 = scalar_lea.vmem %s32_s12, 256  ;;  %p67_p6 = scmp.lt.s32.totalorder %s32_s12, %s32_s12 }
  0x10   :  { %p63_p5 = scmp.ne.s32.totalorder %s32_s12, %s62_s13  ;;  %p68_p7 = scmp.lt.s32.totalorder %s62_s13, %s62_s13 }
  0x12   :  { %p69_p8 = por %p68_p7, %p67_p6 }
  0x14   :  { %p70_p9 = pnand %p69_p8, %p63_p5 }
  0x16   :  { %73 = shalt.err (!%p70_p9)
}
  0x17   :  { %34 = dma.vmem_to_hbm [thread:$0]  %s32_s12, 256, %s105_s1, [#allocation4]  }
  0x18   :  { %84 = dma.done.wait [#allocation4], 256  }
  0x19   :  { %85 = vsyncadd [#allocation4], 4294967040 }
  0x1a   :  { %38 = vsyncpa [#allocation3], 1 }
  0x1b   :  { %39 = vsyncpa [#allocation4], 1 }

</bundles_post_ra>
